<compile_context>
chip_gen: v7x
topology: tpu7x:2x2x1
jax: 0.10.0
libtpu: 0.0.40
codegen_flags: <defaults>
</compile_context>

<pallas_src>
import functools
import math

import jax
import jax.numpy as jnp
from jax.experimental import pallas as pl
from jax.experimental.pallas import tpu as pltpu


def _round_up(n, m):
    return ((n + m - 1) // m) * m


def ffn_kernel(x_ref, w1_ref, b1_ref, w2_ref, b2_ref, o_ref, *, compute_dtype):
    # x_ref:  (TM, d_model_p)                  -- one row tile
    # w1_ref: (d_model_p, d_ff_p)  b1_ref: (1, d_ff_p)      (VMEM-resident)
    # w2_ref: (d_ff_p, d_model_p)  b2_ref: (1, d_model_p)   (VMEM-resident)
    x = x_ref[...].astype(compute_dtype)
    h = jnp.dot(x, w1_ref[...], preferred_element_type=jnp.float32)
    h = jnp.maximum(h + b1_ref[...], 0.0)                 # bias + ReLU in f32 (VPU)
    y = jnp.dot(h.astype(compute_dtype), w2_ref[...],
                preferred_element_type=jnp.float32)
    o_ref[...] = (y + b2_ref[...]).astype(o_ref.dtype)


def position_wise_feed_forward(x, w1, b1, w2, b2, *, block_m=512,
                               compute_dtype=jnp.bfloat16):
    """y = Linear2(ReLU(Linear1(x))); x: (batch, seq, d_model)."""
    batch, seq, d_model = x.shape
    d_ff = w1.shape[1]
    m = batch * seq

    # Lane-dense padding: feature dims -> multiples of 128; rows -> tile size.
    dm_p = _round_up(d_model, 128)
    dff_p = _round_up(d_ff, 128)
    tm = min(block_m, _round_up(m, 8))
    m_p = _round_up(m, tm)

    x2d = jnp.pad(x.reshape(m, d_model), ((0, m_p - m), (0, dm_p - d_model)))
    # Weights cast once to the MXU operand dtype outside the kernel (halves
    # their resident VMEM footprint and HBM traffic); biases stay f32 so the
    # bias-add/ReLU math matches the PyTorch reference. Zero padding is exact:
    # padded d_ff columns produce h==0 (bias pad is 0) and padded d_model
    # output columns are sliced off below.
    w1_p = jnp.pad(w1, ((0, dm_p - d_model), (0, dff_p - d_ff))).astype(compute_dtype)
    w2_p = jnp.pad(w2, ((0, dff_p - d_ff), (0, dm_p - d_model))).astype(compute_dtype)
    b1_p = jnp.pad(b1, (0, dff_p - d_ff)).reshape(1, dff_p).astype(jnp.float32)
    b2_p = jnp.pad(b2, (0, dm_p - d_model)).reshape(1, dm_p).astype(jnp.float32)

    grid = (m_p // tm,)

    # Advisory cost for XLA's scheduler around this custom call.
    bytes_accessed = (x2d.size * x2d.dtype.itemsize
                      + w1_p.size * w1_p.dtype.itemsize
                      + w2_p.size * w2_p.dtype.itemsize
                      + b1_p.size * 4 + b2_p.size * 4
                      + m_p * dm_p * x.dtype.itemsize)
    cost = pl.CostEstimate(flops=4 * m_p * dm_p * dff_p,   # 2 matmuls x 2 flop/MAC
                           transcendentals=0,
                           bytes_accessed=bytes_accessed)

    # VMEM budget: double-buffered x/out tiles + resident weights/biases +
    # f32 intermediates. Clamp to a range valid on v5e/v6e/v7x.
    cd_bytes = jnp.dtype(compute_dtype).itemsize
    vmem_need = (2 * tm * dm_p * x2d.dtype.itemsize        # x tile (x2 buffers)
                 + 2 * tm * dm_p * x.dtype.itemsize        # out tile (x2 buffers)
                 + 2 * dm_p * dff_p * cd_bytes             # resident w1 + w2
                 + (dff_p + dm_p) * 4                      # biases
                 + tm * dff_p * 4 + tm * dm_p * 4)         # f32 h, y
    vmem_limit = int(min(max(2 * vmem_need, 32 << 20), 96 << 20))

    out2d = pl.pallas_call(
        functools.partial(ffn_kernel, compute_dtype=compute_dtype),
        out_shape=jax.ShapeDtypeStruct((m_p, dm_p), x.dtype),
        grid=grid,
        in_specs=[
            pl.BlockSpec((tm, dm_p), lambda i: (i, 0)),     # x row tile
            pl.BlockSpec((dm_p, dff_p), lambda i: (0, 0)),  # w1 (resident)
            pl.BlockSpec((1, dff_p), lambda i: (0, 0)),     # b1 (resident)
            pl.BlockSpec((dff_p, dm_p), lambda i: (0, 0)),  # w2 (resident)
            pl.BlockSpec((1, dm_p), lambda i: (0, 0)),      # b2 (resident)
        ],
        out_specs=pl.BlockSpec((tm, dm_p), lambda i: (i, 0)),
        compiler_params=pltpu.CompilerParams(
            dimension_semantics=("parallel",),
            vmem_limit_bytes=vmem_limit),
        cost_estimate=cost,
    )(x2d, w1_p, b1_p, w2_p, b2_p)

    return out2d[:m, :d_model].reshape(batch, seq, d_model)


def init_params(key, d_model, d_ff, dtype=jnp.float32):
    """Deterministic init matching nn.Linear's U(-1/sqrt(fan_in), 1/sqrt(fan_in))."""
    k1, k2, k3, k4 = jax.random.split(key, 4)
    bound1 = 1.0 / math.sqrt(d_model)
    bound2 = 1.0 / math.sqrt(d_ff)
    # Stored already transposed relative to PyTorch (weight.T) so kernel does x @ W.
    w1 = jax.random.uniform(k1, (d_model, d_ff), dtype, -bound1, bound1)
    b1 = jax.random.uniform(k2, (d_ff,), dtype, -bound1, bound1)
    w2 = jax.random.uniform(k3, (d_ff, d_model), dtype, -bound2, bound2)
    b2 = jax.random.uniform(k4, (d_model,), dtype, -bound2, bound2)
    return w1, b1, w2, b2


if __name__ == "__main__":
    key = jax.random.PRNGKey(0)
    kx, kp, krest = jax.random.split(key, 3)

    # Case 1: lane-aligned feature dims (128-multiples), bf16 MXU operands.
    batch, seq, d_model, d_ff = 2, 8, 128, 256
    x = jax.random.normal(kx, (batch, seq, d_model), jnp.float32)
    w1, b1, w2, b2 = init_params(kp, d_model, d_ff)
    out = jax.block_until_ready(position_wise_feed_forward(x, w1, b1, w2, b2))
    ref = jnp.maximum(x @ w1 + b1, 0.0) @ w2 + b2
    assert out.shape == (batch, seq, d_model)
    assert jnp.allclose(out, ref, atol=2e-2, rtol=2e-2), (
        "max abs err %f" % float(jnp.max(jnp.abs(out - ref))))

    # Case 2: non-128 feature dims exercise the zero-padding path; f32 compute
    # dtype gives a tight numerical check against the reference.
    kx2, kp2 = jax.random.split(krest)
    batch2, seq2, dm2, dff2 = 2, 8, 32, 64
    x2 = jax.random.normal(kx2, (batch2, seq2, dm2), jnp.float32)
    w1b, b1b, w2b, b2b = init_params(kp2, dm2, dff2)
    out2 = jax.block_until_ready(
        position_wise_feed_forward(x2, w1b, b1b, w2b, b2b,
                                   compute_dtype=jnp.float32))
    ref2 = jnp.maximum(x2 @ w1b + b1b, 0.0) @ w2b + b2b
    assert out2.shape == (batch2, seq2, dm2)
    assert jnp.allclose(out2, ref2, atol=1e-5, rtol=1e-5)

    print("KERNEL_OK")
</pallas_src>

<mosaic_0001>
module attributes {stable_mosaic.version = 11 : i64} {
  func.func @ffn_kernel(%arg0: i32, %arg1: memref<16x128xf32, #tpu.memory_space<vmem>>, %arg2: memref<128x256xbf16, #tpu.memory_space<vmem>>, %arg3: memref<1x256xf32, #tpu.memory_space<vmem>>, %arg4: memref<256x128xbf16, #tpu.memory_space<vmem>>, %arg5: memref<1x128xf32, #tpu.memory_space<vmem>>, %arg6: memref<16x128xf32, #tpu.memory_space<vmem>>) attributes {dimension_semantics = [#tpu.dimension_semantics<parallel>], iteration_bounds = array<i64: 1>, scalar_prefetch = 0 : i64, scratch_operands = 0 : i64, tpu.core_type = #tpu.core_type<tc>, window_params = [{transform_indices = @transform_0, window_bounds = array<i64: 16, 128>}, {pipeline_mode = #tpu.pipeline_mode<synchronous>, transform_indices = @transform_1, window_bounds = array<i64: 128, 256>}, {pipeline_mode = #tpu.pipeline_mode<synchronous>, transform_indices = @transform_2, window_bounds = array<i64: 1, 256>}, {pipeline_mode = #tpu.pipeline_mode<synchronous>, transform_indices = @transform_3, window_bounds = array<i64: 256, 128>}, {pipeline_mode = #tpu.pipeline_mode<synchronous>, transform_indices = @transform_4, window_bounds = array<i64: 1, 128>}, {transform_indices = @transform_5, window_bounds = array<i64: 16, 128>}]} {
    %c0 = arith.constant 0 : index
    %c0_0 = arith.constant 0 : index
    %0 = vector.load %arg1[%c0, %c0_0] : memref<16x128xf32, #tpu.memory_space<vmem>>, vector<16x128xf32>
    %1 = arith.truncf %0 : vector<16x128xf32> to vector<16x128xbf16>
    %c0_1 = arith.constant 0 : index
    %c0_2 = arith.constant 0 : index
    %2 = vector.load %arg2[%c0_1, %c0_2] : memref<128x256xbf16, #tpu.memory_space<vmem>>, vector<128x256xbf16>
    %cst = arith.constant dense<0.000000e+00> : vector<16x256xf32>
    %3 = tpu.matmul %1, %2, %cst {dimension_numbers = #tpu.dot_dimension_numbers<[1], [0], [0], [1], [0, 0, 1, 1], [], []>} : vector<16x128xbf16>, vector<128x256xbf16>, vector<16x256xf32> -> vector<16x256xf32>
    %c0_3 = arith.constant 0 : index
    %c0_4 = arith.constant 0 : index
    %4 = vector.load %arg3[%c0_3, %c0_4] : memref<1x256xf32, #tpu.memory_space<vmem>>, vector<1x256xf32>
    %5 = vector.broadcast %4 : vector<1x256xf32> to vector<16x256xf32>
    %6 = arith.addf %3, %5 : vector<16x256xf32>
    %cst_5 = arith.constant 0.000000e+00 : f32
    %7 = vector.broadcast %cst_5 : f32 to vector<16x256xf32>
    %8 = arith.maximumf %6, %7 : vector<16x256xf32>
    %9 = arith.truncf %8 : vector<16x256xf32> to vector<16x256xbf16>
    %c0_6 = arith.constant 0 : index
    %c0_7 = arith.constant 0 : index
    %10 = vector.load %arg4[%c0_6, %c0_7] : memref<256x128xbf16, #tpu.memory_space<vmem>>, vector<256x128xbf16>
    %cst_8 = arith.constant dense<0.000000e+00> : vector<16x128xf32>
    %11 = tpu.matmul %9, %10, %cst_8 {dimension_numbers = #tpu.dot_dimension_numbers<[1], [0], [0], [1], [0, 0, 1, 1], [], []>} : vector<16x256xbf16>, vector<256x128xbf16>, vector<16x128xf32> -> vector<16x128xf32>
    %c0_9 = arith.constant 0 : index
    %c0_10 = arith.constant 0 : index
    %12 = vector.load %arg5[%c0_9, %c0_10] : memref<1x128xf32, #tpu.memory_space<vmem>>, vector<1x128xf32>
    %13 = vector.broadcast %12 : vector<1x128xf32> to vector<16x128xf32>
    %14 = arith.addf %11, %13 : vector<16x128xf32>
    %c0_11 = arith.constant 0 : index
    %c0_12 = arith.constant 0 : index
    %15 = vector.load %arg6[%c0_11, %c0_12] : memref<16x128xf32, #tpu.memory_space<vmem>>, vector<16x128xf32>
    tpu.vector_store %arg6[%c0_11, %c0_12], %14 {strides = array<i32>} : memref<16x128xf32, #tpu.memory_space<vmem>>, vector<16x128xf32>,
    return
  }
  func.func @transform_0(%arg0: i32) -> (i32, i32) {
    %c0_i32 = arith.constant 0 : i32
    %c0_i32_0 = arith.constant 0 : i32
    return %arg0, %c0_i32 : i32, i32
  }
  func.func @transform_1(%arg0: i32) -> (i32, i32) {
    %c0_i32 = arith.constant 0 : i32
    %c0_i32_0 = arith.constant 0 : i32
    %c0_i32_1 = arith.constant 0 : i32
    return %c0_i32, %c0_i32_0 : i32, i32
  }
  func.func @transform_2(%arg0: i32) -> (i32, i32) {
    %c0_i32 = arith.constant 0 : i32
    %c0_i32_0 = arith.constant 0 : i32
    %c0_i32_1 = arith.constant 0 : i32
    return %c0_i32, %c0_i32_0 : i32, i32
  }
  func.func @transform_3(%arg0: i32) -> (i32, i32) {
    %c0_i32 = arith.constant 0 : i32
    %c0_i32_0 = arith.constant 0 : i32
    %c0_i32_1 = arith.constant 0 : i32
    return %c0_i32, %c0_i32_0 : i32, i32
  }
  func.func @transform_4(%arg0: i32) -> (i32, i32) {
    %c0_i32 = arith.constant 0 : i32
    %c0_i32_0 = arith.constant 0 : i32
    %c0_i32_1 = arith.constant 0 : i32
    return %c0_i32, %c0_i32_0 : i32, i32
  }
  func.func @transform_5(%arg0: i32) -> (i32, i32) {
    %c0_i32 = arith.constant 0 : i32
    %c0_i32_0 = arith.constant 0 : i32
    return %arg0, %c0_i32 : i32, i32
  }
}

</mosaic_0001>

<bundles_post_ra>
// kernel: tpu_custom_call.1
= control target key start
LH: loop header
LB: loop body
LE: loop exit
PB: predicated region body
PF: predicated region fallthrough
CT: control target
= control target key end

     0   :  { %10 = vsyncpa [#allocation3], 0  ;;  %s726_s0 = inlined_call_operand.hbm [shape: f32[16,128], index: 0, kind: input, shape index: {}]   ;;  %s727_s1 = inlined_call_operand.hbm [shape: bf16[128,256], index: 1, kind: input, shape index: {}]   ;;  %s728_s2 = inlined_call_operand.vmem [shape: f32[1,256], index: 2, kind: input, shape index: {}]   ;;  %s729_s3 = inlined_call_operand.hbm [shape: bf16[256,128], index: 3, kind: input, shape index: {}]   ;;  %s730_s4 = inlined_call_operand.vmem [shape: f32[1,128], index: 4, kind: input, shape index: {}]   ;;  %s731_s5 = inlined_call_operand.hbm [shape: f32[16,128], index: 5, kind: output, shape index: {}]  }
   0x1   :  { %11 = vsyncpa [#allocation6], 0 }
   0x2   :  { %12 = vsyncpa [#allocation4], 0  ;;  %s617_s18 = smov [#allocation5]   ;;  %s618_s20 = smov [#allocation2]  }
   0x3   :  { %s30_s19 = sshll.u32 %s617_s18, 4  ;;  %s18_s21 = sshll.u32 %s618_s20, 4  ;;  %s31_s19 = int_to_ptr.vmem [resolvable:$true] %s30_s19  ;;  %s656_s21 = int_to_ptr.vmem [resolvable:$true] %s18_s21 }
   0x4   :  { %s523_s24 = scalar_lea.hbm %s727_s1, 2048 }
   0x5   :  { %p524_p0 = scmp.ne.s32.totalorder %s727_s1, %s523_s24  ;;  %p527_p1 = scmp.lt.u32.totalorder %s523_s24, %s727_s1 }
   0x7   :  { %p529_p2 = pnand %p527_p1, %p524_p0 }
   0x9   :  { %532 = shalt.err (!%p529_p2)
}
   0xa   :  { %s533_s29 = scalar_lea.vmem %s31_s19, 2048  ;;  %p538_p4 = scmp.lt.s32.totalorder %s31_s19, %s31_s19 }
   0xb   :  { %p534_p3 = scmp.ne.s32.totalorder %s31_s19, %s533_s29  ;;  %p539_p5 = scmp.lt.s32.totalorder %s533_s29, %s533_s29 }
   0xd   :  { %p540_p6 = por %p539_p5, %p538_p4 }
   0xf   :  { %p541_p7 = pnand %p540_p6, %p534_p3 }
  0x11   :  { %544 = shalt.err (!%p541_p7)
}
  0x12   :  { %s619_s30 = smov 128   ;;  %s620_s6 = smov 8  }
  0x13   :  { %36 = dma.hbm_to_vmem [thread:$0]  %s727_s1, 2048, %s31_s19, [#allocation6], %s619_s30, %s619_s30, %s620_s6  }
  0x14   :  { %s545_s11 = scalar_lea.hbm %s726_s0, 256 }
  0x15   :  { %p546_p8 = scmp.ne.s32.totalorder %s726_s0, %s545_s11  ;;  %p549_p9 = scmp.lt.u32.totalorder %s545_s11, %s726_s0 }
  0x17   :  { %p551_p10 = pnand %p549_p9, %p546_p8 }
  0x19   :  { %554 = shalt.err (!%p551_p10)
}
  0x1a   :  { %s555_s16 = scalar_lea.vmem %s656_s21, 256  ;;  %p560_p12 = scmp.lt.s32.totalorder %s656_s21, %s656_s21 }
  0x1b   :  { %p556_p11 = scmp.ne.s32.totalorder %s656_s21, %s555_s16  ;;  %p561_p13 = scmp.lt.s32.totalorder %s555_s16, %s555_s16 }
  0x1d   :  { %p562_p0 = por %p561_p13, %p560_p12 }
  0x1f   :  { %p563_p1 = pnand %p562_p0, %p556_p11 }
  0x21   :  { %566 = shalt.err (!%p563_p1)
}
  0x22   :  { %24 = dma.hbm_to_vmem [thread:$0]  %s726_s0, 256, %s656_s21, [#allocation3], %s619_s30, %s619_s30, %s620_s6  }
  0x23   :  { %s621_s18 = smov [#allocation7]   ;;  %s567_s23 = scalar_lea.hbm %s729_s3, 2048 }
  0x24   :  { %s44_s19 = sshll.u32 %s621_s18, 4  ;;  %p568_p2 = scmp.ne.s32.totalorder %s729_s3, %s567_s23  ;;  %s45_s19 = int_to_ptr.vmem [resolvable:$true] %s44_s19 }
  0x25   :  { %p571_p3 = scmp.lt.u32.totalorder %s567_s23, %s729_s3 }
  0x27   :  { %p573_p4 = pnand %p571_p3, %p568_p2 }
  0x29   :  { %576 = shalt.err (!%p573_p4)
}
  0x2a   :  { %s577_s28 = scalar_lea.vmem %s45_s19, 2048  ;;  %p582_p6 = scmp.lt.s32.totalorder %s45_s19, %s45_s19 }
  0x2b   :  { %p578_p5 = scmp.ne.s32.totalorder %s45_s19, %s577_s28  ;;  %p583_p7 = scmp.lt.s32.totalorder %s577_s28, %s577_s28 }
  0x2d   :  { %p584_p8 = por %p583_p7, %p582_p6 }
  0x2f   :  { %p585_p9 = pnand %p584_p8, %p578_p5 }
  0x31   :  { %588 = shalt.err (!%p585_p9)
}
  0x32   :  { %s622_s0 = smov 64   ;;  %s623_s21 = smov 4  }
  0x33   :  { %50 = dma.hbm_to_vmem [thread:$0]  %s729_s3, 2048, %s45_s19, [#allocation6], %s622_s0, %s622_s0, %s623_s21  }
  0x34   :  { %611 = dma.done.wait [#allocation3], 256  }
  0x35   :  { %612 = vsyncadd [#allocation3], 4294967040 }
  0x36   :  { %613 = dma.done.wait [#allocation6], 4096  }
  0x37   :  { %614 = vsyncadd [#allocation6], 4294963200  ;;  %v624_v0 = vmov 0   ;;  %v483_v1 = vld [vmem:[#allocation5 + $0x4] ss:$8 sps:$4 sm:$0xff]   ;;  %v511_v16 = vld [vmem:[#allocation7 + $0x50] sm:$0xff]   ;;  %v84_v36 = vlaneseq }
  0x38   :  { %206 = vmatprep.mubr.bf16.mxu0 %v624_v0  ;;  %v485_v2 = vld [vmem:[#allocation5] ss:$8 sps:$4 sm:$0xff]   ;;  %174 = vmatprep.subr.bf16.mxu0 %v483_v1  ;;  %v486_v3 = vld [vmem:[#allocation5 + $0x14] ss:$8 sps:$4 sm:$0xff]   ;;  %v488_v4 = vld [vmem:[#allocation5 + $0x10] ss:$8 sps:$4 sm:$0xff]  }
  0x39   :  { %175 = vmatpush1.bf16.msra.mxu0 %v485_v2  ;;  %v489_v5 = vld [vmem:[#allocation5 + $0x24] ss:$8 sps:$4 sm:$0xff]   ;;  %v491_v6 = vld [vmem:[#allocation5 + $0x20] ss:$8 sps:$4 sm:$0xff]   ;;  %v492_v7 = vld [vmem:[#allocation5 + $0x34] ss:$8 sps:$4 sm:$0xff]  }
  0x3a   :  { %176 = vmatprep.subr.bf16.mxu0 %v486_v3  ;;  %v494_v8 = vld [vmem:[#allocation5 + $0x30] ss:$8 sps:$4 sm:$0xff]   ;;  %v495_v9 = vld [vmem:[#allocation5 + $0x44] ss:$8 sps:$4 sm:$0xff]   ;;  %v497_v11 = vld [vmem:[#allocation5 + $0x40] ss:$8 sps:$4 sm:$0xff]  }
  0x3b   :  { %v507_v10 = vld [vmem:[#allocation7 + $0x40] sm:$0xff]   ;;  %v498_v13 = vld [vmem:[#allocation5 + $0x54] ss:$8 sps:$4 sm:$0xff]   ;;  %v509_v14 = vld [vmem:[#allocation7 + $0x48] sm:$0xff]   ;;  %v85_v37 = vshrl.u32 %v84_v36, 7  ;;  %s625_s10 = smov [#allocation8]  }
  0x3c   :  { %v508_v12 = vld [vmem:[#allocation7] sm:$0xff]   ;;  %452 = vmatprep.subr.bf16.mxu1 %v507_v10  ;;  %v510_v15 = vld [vmem:[#allocation7 + $0x8] sm:$0xff]   ;;  %v500_v17 = vld [vmem:[#allocation5 + $0x50] ss:$8 sps:$4 sm:$0xff]   ;;  %s406_s11 = sshll.u32 %s625_s10, 4  ;;  %s407_s11 = int_to_ptr.vmem [resolvable:$true] %s406_s11 }
  0x3d   :  { %177 = vmatpush1.bf16.msra.mxu0 %v488_v4  ;;  %453 = vmatpush3.bf16.msra.mxu1 %v508_v12  ;;  %v501_v18 = vld [vmem:[#allocation5 + $0x64] ss:$8 sps:$4 sm:$0xff]   ;;  %v512_v19 = vld [vmem:[#allocation7 + $0x10] sm:$0xff]   ;;  %v513_v20 = vld [vmem:[#allocation7 + $0x58] sm:$0xff]   ;;  %v86_v38 = vsub.s32 0, %v85_v37  ;;  %v90_v40 = vsub.s32 1, %v85_v37  ;;  %p594_p11 = scmp.lt.s32.totalorder %s407_s11, %s407_s11 }
  0x3e   :  { %178 = vmatprep.subr.bf16.mxu0 %v489_v5  ;;  %454 = vmatprep.subr.bf16.mxu1 %v509_v14  ;;  %v503_v21 = vld [vmem:[#allocation5 + $0x60] ss:$8 sps:$4 sm:$0xff]   ;;  %v504_v22 = vld [vmem:[#allocation5 + $0x74] ss:$8 sps:$4 sm:$0xff]   ;;  %v506_v25 = vld [vmem:[#allocation5 + $0x70] ss:$8 sps:$4 sm:$0xff]  }
  0x3f   :  { %v514_v23 = vld [vmem:[#allocation7 + $0x18] sm:$0xff]   ;;  %v515_v24 = vld [vmem:[#allocation7 + $0x60] sm:$0xff]   ;;  %v63_v26 = vld [vmem:[#allocation2] sm:$0xff]  ;;  %s589_s12 = scalar_lea.vmem %s407_s11, 256 }
  0x40   :  { %v64_v27 = vld [vmem:[#allocation2 + $0x8] sm:$0xff]  ;;  %v516_v28 = vld [vmem:[#allocation7 + $0x20] sm:$0xff]   ;;  %v517_v29 = vld [vmem:[#allocation7 + $0x68] sm:$0xff]   ;;  %p590_p10 = scmp.ne.s32.totalorder %s407_s11, %s589_s12  ;;  %p595_p12 = scmp.lt.s32.totalorder %s589_s12, %s589_s12 }
  0x41   :  { %179 = vmatpush1.bf16.msra.mxu0 %v491_v6  ;;  %455 = vmatpush3.bf16.msra.mxu1 %v510_v15  ;;  %v65_v30 = vpack.c.bf16 %v64_v27, %v63_v26  ;;  %v518_v31 = vld [vmem:[#allocation7 + $0x28] sm:$0xff]   ;;  %v519_v32 = vld [vmem:[#allocation7 + $0x70] sm:$0xff]   ;;  %v521_v34 = vld [vmem:[#allocation7 + $0x78] sm:$0xff]  }
  0x42   :  { %180 = vmatprep.subr.bf16.mxu0 %v492_v7  ;;  %456 = vmatprep.subr.bf16.mxu1 %v511_v16  ;;  %v520_v33 = vld [vmem:[#allocation7 + $0x30] sm:$0xff]   ;;  %v522_v35 = vld [vmem:[#allocation7 + $0x38] sm:$0xff]   ;;  %p596_p13 = por %p595_p12, %p594_p11 }
  0x43   :  { %v82_v39 = vld [vmem:[%s728_s2] sm:$0x3] }
  0x44   :  { %v87_v41 = vrot.slane %v82_v39, %v86_v38  ;;  %v91_v42 = vrot.slane %v82_v39, %v90_v40  ;;  %v435_v58 = vld [vmem:[%s730_s4] ss:$0 sm:$0xff]  ;;  %p597_p0 = pnand %p596_p13, %p590_p10 }
  0x45   :  { %181 = vmatpush1.bf16.msra.mxu0 %v494_v8  ;;  %457 = vmatpush3.bf16.msra.mxu1 %v512_v19 }
  0x46   :  { %182 = vmatprep.subr.bf16.mxu0 %v495_v9  ;;  %458 = vmatprep.subr.bf16.mxu1 %v513_v20 }
  0x49   :  { %183 = vmatpush1.bf16.msra.mxu0 %v497_v11  ;;  %459 = vmatpush3.bf16.msra.mxu1 %v514_v23 }
  0x4a   :  { %184 = vmatprep.subr.bf16.mxu0 %v498_v13  ;;  %460 = vmatprep.subr.bf16.mxu1 %v515_v24 }
  0x4d   :  { %185 = vmatpush1.bf16.msra.mxu0 %v500_v17  ;;  %461 = vmatpush3.bf16.msra.mxu1 %v516_v28 }
  0x4e   :  { %186 = vmatprep.subr.bf16.mxu0 %v501_v18  ;;  %462 = vmatprep.subr.bf16.mxu1 %v517_v29 }
  0x51   :  { %187 = vmatpush1.bf16.msra.mxu0 %v503_v21  ;;  %463 = vmatpush3.bf16.msra.mxu1 %v518_v31 }
  0x52   :  { %188 = vmatprep.subr.bf16.mxu0 %v504_v22  ;;  %464 = vmatprep.subr.bf16.mxu1 %v519_v32 }
  0x55   :  { %189 = vmatpush1.bf16.msra.mxu0 %v506_v25  ;;  %465 = vmatpush3.bf16.msra.mxu1 %v520_v33 }
  0x56   :  { %466 = vmatprep.subr.bf16.mxu1 %v521_v34 }
  0x58   :  { %207 = vmatmul.mubr.bf16.vlgmr.msra.gmra.mrb[0].mxu0 %v65_v30 }
  0x59   :  { %467 = vmatpush3.bf16.msra.mxu1 %v522_v35 }
 0x12b   :  { %v208_v43 = vpop.f32.mrb[0].mxu0 }
 0x12c   :  { %v209_v44 = vadd.f32 %v208_v43, %v87_v41  ;;  %v210_v45 = vpop.f32.mrb[1].mxu0 }
 0x12d   :  { %v211_v46 = vadd.f32 %v210_v45, %v91_v42  ;;  %v212_v47 = vpop.f32.mrb[2].mxu0 }
 0x12e   :  { %v213_v48 = vadd.f32 %v212_v47, %v87_v41  ;;  %v214_v49 = vpop.f32.mrb[3].mxu0  ;;  %v217_v51 = vmax.f32 %v209_v44, 0.0 }
 0x12f   :  { %v215_v50 = vadd.f32 %v214_v49, %v91_v42  ;;  %v218_v53 = vmax.f32 %v211_v46, 0.0 }
 0x130   :  { %v219_v52 = vmax.f32 %v213_v48, 0.0 }
 0x131   :  { %v220_v54 = vmax.f32 %v215_v50, 0.0 }
 0x132   :  { %v221_v55 = vpack.c.bf16 %v219_v52, %v217_v51 }
 0x133   :  { %v222_v56 = vpack.c.bf16 %v220_v54, %v218_v53 }
 0x135   :  { %390 = vmatprep.mubr.bf16.mxu1 %v222_v56 }
 0x136   :  { %391 = vmatmul.mubr.bf16.vlgmr.msra.gmra.mrb[0].mxu1 %v221_v55 }
 0x209   :  { %v468_v57 = vpop.f32.mrb[0].mxu1 }
 0x20a   :  { %v469_v59 = vpop.f32.mrb[1].mxu1 }
 0x20b   :  { %v470_v60 = vadd.f32 %v469_v59, %v468_v57  ;;  %v471_v61 = vpop.f32.mrb[2].mxu1 }
 0x20c   :  { %v472_v62 = vpop.f32.mrb[3].mxu1 }
 0x20d   :  { %v393_v63 = vadd.f32 %v470_v60, %v435_v58  ;;  %v473_v0 = vadd.f32 %v472_v62, %v471_v61 }
 0x20f   :  { %399 = vst [vmem:[#allocation8] sm:$0xff] %v393_v63  ;;  %v396_v1 = vadd.f32 %v473_v0, %v435_v58 }
 0x211   :  { %400 = vst [vmem:[#allocation8 + $0x8] sm:$0xff] %v396_v1 }
 0x212   :  { %600 = shalt.err (!%p597_p0)
}
 0x213   :  { %s601_s14 = scalar_lea.hbm %s731_s5, 256 }
 0x214   :  { %p602_p1 = scmp.ne.s32.totalorder %s731_s5, %s601_s14  ;;  %p605_p2 = scmp.lt.u32.totalorder %s601_s14, %s731_s5 }
 0x216   :  { %p607_p3 = pnand %p605_p2, %p602_p1 }
 0x218   :  { %610 = shalt.err (!%p607_p3)
}
 0x219   :  { %412 = dma.vmem_to_hbm [thread:$0]  %s407_s11, 256, %s731_s5, [#allocation4], %s619_s30, %s619_s30, %s620_s6  }
 0x21a   :  { %615 = dma.done.wait [#allocation4], 256  }
 0x21b   :  { %616 = vsyncadd [#allocation4], 4294967040 }
 0x21c   :  { %416 = vsyncpa [#allocation3], 1 }
 0x21d   :  { %417 = vsyncpa [#allocation6], 1 }
 0x21e   :  { %418 = vsyncpa [#allocation4], 1 }

</bundles_post_ra>
